<compile_context>
chip_gen: v6e
topology: v6e:2x2x1
jax: 0.10.0
libtpu: 0.0.40
codegen_flags: <defaults>
</compile_context>

<pallas_src>
import jax
import jax.numpy as jnp
from jax.experimental import pallas as pl
from jax.experimental.pallas import tpu as pltpu


def _round_up(x: int, m: int) -> int:
    return ((x + m - 1) // m) * m


def _cdiv(a: int, b: int) -> int:
    return -(-a // b)


def _make_kernel(chw: int, tk: int, nk: int, n_chunks: int):
    last_k = nk - 1
    tail_start = last_k * tk
    needs_mask = (tail_start + tk) > chw  # last k tile extends past CHW

    def kernel(x_ref, w_ref, b_ref, o_ref, acc_ref):
        # x_ref:   (tn, tk)    activation tile (input dtype)
        # w_ref:   (1, k_pad)  fused weight (pool scale folded in), VMEM-resident f32
        # b_ref:   (1,)        bias scalar in SMEM
        # o_ref:   (tn, 1)     output tile, f32
        # acc_ref: (tn, 128)   lane-dense f32 accumulator (resident across k axis)
        k = pl.program_id(1)

        @pl.when(k == 0)
        def _():
            acc_ref[...] = jnp.zeros_like(acc_ref)

        def chunk_body(masked):
            def body(c):
                coff = pl.multiple_of(c * 128, 128)
                woff = pl.multiple_of(k * tk + c * 128, 128)
                xv = x_ref[:, pl.ds(coff, 128)].astype(jnp.float32)
                wv = w_ref[:, pl.ds(woff, 128)]
                if masked:
                    cols = tail_start + c * 128 + jax.lax.broadcasted_iota(
                        jnp.int32, xv.shape, 1)
                    xv = jnp.where(cols < chw, xv, jnp.float32(0))
                acc_ref[...] += xv * wv  # VPU multiply-add; no XLU in the hot loop
            return body

        if needs_mask:
            @pl.when(k == last_k)
            def _():
                pl.loop(0, n_chunks)(chunk_body(True))

            @pl.when(k != last_k)
            def _():
                pl.loop(0, n_chunks)(chunk_body(False))
        else:
            pl.loop(0, n_chunks)(chunk_body(False))

        @pl.when(k == last_k)
        def _():
            # Single cross-lane (XLU) reduce + bias + tanh in the epilogue only.
            total = jnp.sum(acc_ref[...], axis=-1, keepdims=True)  # (tn, 1)
            o_ref[...] = jnp.tanh(total + b_ref[0]).astype(o_ref.dtype)

    return kernel


def fast_rcnn_predictor_padreg(x, weight, bias, *,
                               tn_max: int = 256,
                               block_bytes: int = 8 << 20):
    """x: (N, C, H, W); weight: (1, C); bias: (1,). Returns (N,) float32."""
    N, C, H, W = x.shape
    HW = H * W
    CHW = C * HW
    itemsize = jnp.dtype(x.dtype).itemsize

    # (N, C, H, W) -> (N, CHW): trailing-dim merge (no relayout, no HBM copy).
    x_flat = x.reshape(N, CHW)

    # Fold the adaptive-avg-pool 1/(H*W) into the expanded f32 linear weight:
    #   w_full[0, c*HW + j] = weight[0, c] / HW   (matches flattened layout).
    w_full = jnp.repeat(weight.astype(jnp.float32) / HW, HW, axis=-1)  # (1, CHW)

    # ---- N tiling: multiple of the sublane granularity; aim for >=2 i-tiles
    # so the "parallel" axis can shard across both TensorCores on v7x.
    sub = max(8, 32 // itemsize)            # 8 for f32, 16 for bf16, 32 for 8-bit
    tn = max(sub, min(tn_max, _round_up(_cdiv(N, 2), sub)))
    grid_n = _cdiv(N, tn)

    # ---- K tiling: balanced 128-multiple tiles, x block ~= block_bytes.
    block_bytes = min(block_bytes, 12 << 20)            # v7x VMEM (64 MiB/TC) headroom
    chw_128 = _round_up(CHW, 128)
    tk_cap = max(128, (block_bytes // (tn * itemsize)) // 128 * 128)
    tk_cap = min(tk_cap, chw_128)
    nk = _cdiv(chw_128, tk_cap)
    tk = _round_up(_cdiv(chw_128, nk), 128)             # balanced; waste < 128 lanes/tile
    k_pad = nk * tk
    n_chunks = tk // 128

    # Zero-pad only the tiny fused weight (never the activation).
    if k_pad != CHW:
        w_full = jnp.pad(w_full, ((0, 0), (0, k_pad - CHW)))

    # VMEM budget: double-buffered x blocks + resident weight + out + acc + slack.
    vmem_limit = (2 * tn * tk * itemsize + 2 * k_pad * 4 + 2 * tn * 4
                  + tn * 128 * 4 + (2 << 20))
    vmem_limit = min(max(vmem_limit, 16 << 20), 48 << 20)

    kernel = _make_kernel(CHW, tk, nk, n_chunks)

    out = pl.pallas_call(
        kernel,
        out_shape=jax.ShapeDtypeStruct((N, 1), jnp.float32),
        grid=(grid_n, nk),
        in_specs=[
            pl.BlockSpec((tn, tk), lambda i, k: (i, k)),          # x tiles
            pl.BlockSpec((1, k_pad), lambda i, k: (0, 0)),        # resident fused weight
            pl.BlockSpec(memory_space=pltpu.MemorySpace.SMEM),    # bias scalar
        ],
        out_specs=pl.BlockSpec((tn, 1), lambda i, k: (i, 0)),
        scratch_shapes=[pltpu.VMEM((tn, 128), jnp.float32)],
        compiler_params=pltpu.CompilerParams(
            dimension_semantics=("parallel", "arbitrary"),
            vmem_limit_bytes=vmem_limit),
    )(x_flat, w_full, bias.astype(jnp.float32).reshape(1))

    return out[:, 0]  # (N,) == .squeeze(1)


if __name__ == "__main__":
    key = jax.random.PRNGKey(0)

    # Test 1: small shapes consistent with the module (N=2 ROIs, C=4, 16x16).
    N, C, H, W = 2, 4, 16, 16
    kx, kw, kb, key = jax.random.split(key, 4)
    x = jax.random.normal(kx, (N, C, H, W), dtype=jnp.float32)
    bound = 1.0 / (C ** 0.5)
    weight = jax.random.uniform(kw, (1, C), minval=-bound, maxval=bound,
                                dtype=jnp.float32)
    bias = jax.random.uniform(kb, (1,), minval=-bound, maxval=bound,
                              dtype=jnp.float32)

    out = jax.block_until_ready(fast_rcnn_predictor_padreg(x, weight, bias))
    ref = jnp.tanh(x.mean(axis=(2, 3)) @ weight.T + bias)[:, 0]
    assert out.shape == (N,)
    assert jnp.allclose(out, ref, atol=1e-5, rtol=1e-5)

    # Test 2: ragged shapes (exercises partial N tile and masked k-tail path).
    N2, C2, H2, W2 = 5, 3, 7, 7
    kx2, kw2, kb2, key = jax.random.split(key, 4)
    x2 = jax.random.normal(kx2, (N2, C2, H2, W2), dtype=jnp.float32)
    bound2 = 1.0 / (C2 ** 0.5)
    weight2 = jax.random.uniform(kw2, (1, C2), minval=-bound2, maxval=bound2,
                                 dtype=jnp.float32)
    bias2 = jax.random.uniform(kb2, (1,), minval=-bound2, maxval=bound2,
                               dtype=jnp.float32)

    out2 = jax.block_until_ready(fast_rcnn_predictor_padreg(x2, weight2, bias2))
    ref2 = jnp.tanh(x2.mean(axis=(2, 3)) @ weight2.T + bias2)[:, 0]
    assert out2.shape == (N2,)
    assert jnp.allclose(out2, ref2, atol=1e-5, rtol=1e-5)

    print("KERNEL_OK")
</pallas_src>

<mosaic_0001>
module attributes {stable_mosaic.version = 11 : i64} {
  func.func @kernel(%arg0: i32, %arg1: i32, %arg2: memref<8x1024xf32, #tpu.memory_space<vmem>>, %arg3: memref<1x1024xf32, #tpu.memory_space<vmem>>, %arg4: memref<1xf32, #tpu.memory_space<smem>>, %arg5: memref<8x1xf32, #tpu.memory_space<vmem>>, %arg6: memref<8x128xf32, #tpu.memory_space<vmem>>) attributes {dimension_semantics = [#tpu.dimension_semantics<parallel>, #tpu.dimension_semantics<arbitrary>], iteration_bounds = array<i64: 1, 1>, scalar_prefetch = 0 : i64, scratch_operands = 1 : i64, tpu.core_type = #tpu.core_type<tc>, window_params = [{transform_indices = @transform_0, window_bounds = array<i64: 8, 1024>}, {pipeline_mode = #tpu.pipeline_mode<synchronous>, transform_indices = @transform_1, window_bounds = array<i64: 1, 1024>}, {transform_indices = @transform_2, window_bounds = array<i64: 1>}, {transform_indices = @transform_3, window_bounds = array<i64: 8, 1>}]} {
    %c0_i32 = arith.constant 0 : i32
    %0 = arith.cmpi eq, %arg1, %c0_i32 : i32
    %1 = arith.extui %0 : i1 to i32
    %c0_i32_0 = arith.constant 0 : i32
    %2 = arith.cmpi ne, %1, %c0_i32_0 : i32
    scf.if %2 {
      %cst = arith.constant 0.000000e+00 : f32
      %7 = vector.broadcast %cst : f32 to vector<8x128xf32>
      %c0 = arith.constant 0 : index
      %c0_5 = arith.constant 0 : index
      %8 = vector.load %arg6[%c0, %c0_5] : memref<8x128xf32, #tpu.memory_space<vmem>>, vector<8x128xf32>
      tpu.vector_store %arg6[%c0, %c0_5], %7 {strides = array<i32>} : memref<8x128xf32, #tpu.memory_space<vmem>>, vector<8x128xf32>,
    } else {
    }
    %c0_i32_1 = arith.constant 0 : i32
    %c8_i32 = arith.constant 8 : i32
    %3 = arith.addi %c0_i32_1, %c8_i32 : i32
    %c1_i32 = arith.constant 1 : i32
    scf.for %arg7 = %c0_i32_1 to %3 step %c1_i32  : i32 {
      %c1_i32_5 = arith.constant 1 : i32
      %7 = arith.muli %arg7, %c1_i32_5 : i32
      %c0_i32_6 = arith.constant 0 : i32
      %8 = arith.addi %c0_i32_6, %7 : i32
      %c128_i32 = arith.constant 128 : i32
      %9 = arith.muli %8, %c128_i32 : i32
      %10 = tpu.assume_multiple %9, 128 : i32
      %c1024_i32 = arith.constant 1024 : i32
      %11 = arith.muli %arg1, %c1024_i32 : i32
      %c128_i32_7 = arith.constant 128 : i32
      %12 = arith.muli %8, %c128_i32_7 : i32
      %13 = arith.addi %11, %12 : i32
      %14 = tpu.assume_multiple %13, 128 : i32
      %c0 = arith.constant 0 : index
      %15 = arith.index_cast %10 : i32 to index
      %16 = vector.load %arg2[%c0, %15] : memref<8x1024xf32, #tpu.memory_space<vmem>>, vector<8x128xf32>
      %c0_8 = arith.constant 0 : index
      %17 = arith.index_cast %14 : i32 to index
      %18 = vector.load %arg3[%c0_8, %17] : memref<1x1024xf32, #tpu.memory_space<vmem>>, vector<1x128xf32>
      %c0_9 = arith.constant 0 : index
      %c0_10 = arith.constant 0 : index
      %19 = vector.load %arg6[%c0_9, %c0_10] : memref<8x128xf32, #tpu.memory_space<vmem>>, vector<8x128xf32>
      %20 = vector.broadcast %18 : vector<1x128xf32> to vector<8x128xf32>
      %21 = arith.mulf %16, %20 : vector<8x128xf32>
      %22 = arith.addf %19, %21 : vector<8x128xf32>
      %c0_11 = arith.constant 0 : index
      %c0_12 = arith.constant 0 : index
      %23 = vector.load %arg6[%c0_11, %c0_12] : memref<8x128xf32, #tpu.memory_space<vmem>>, vector<8x128xf32>
      tpu.vector_store %arg6[%c0_11, %c0_12], %22 {strides = array<i32>} : memref<8x128xf32, #tpu.memory_space<vmem>>, vector<8x128xf32>,
    }
    %c8_i32_2 = arith.constant 8 : i32
    %c0_i32_3 = arith.constant 0 : i32
    %4 = arith.cmpi eq, %arg1, %c0_i32_3 : i32
    %5 = arith.extui %4 : i1 to i32
    %c0_i32_4 = arith.constant 0 : i32
    %6 = arith.cmpi ne, %5, %c0_i32_4 : i32
    scf.if %6 {
      %c0 = arith.constant 0 : index
      %c0_5 = arith.constant 0 : index
      %7 = vector.load %arg6[%c0, %c0_5] : memref<8x128xf32, #tpu.memory_space<vmem>>, vector<8x128xf32>
      %cst = arith.constant dense<0.000000e+00> : vector<8xf32>
      %8 = vector.multi_reduction <add>, %7, %cst [1] : vector<8x128xf32> to vector<8xf32>
      %9 = vector.shape_cast %8 : vector<8xf32> to vector<8x1xf32>
      %c0_6 = arith.constant 0 : index
      %10 = memref.load %arg4[%c0_6] : memref<1xf32, #tpu.memory_space<smem>>
      %11 = vector.broadcast %10 : f32 to vector<8x1xf32>
      %12 = arith.addf %9, %11 : vector<8x1xf32>
      %13 = math.tanh %12 : vector<8x1xf32>
      %c0_7 = arith.constant 0 : index
      %c0_8 = arith.constant 0 : index
      %14 = vector.load %arg5[%c0_7, %c0_8] : memref<8x1xf32, #tpu.memory_space<vmem>>, vector<8x1xf32>
      tpu.vector_store %arg5[%c0_7, %c0_8], %13 {strides = array<i32>} : memref<8x1xf32, #tpu.memory_space<vmem>>, vector<8x1xf32>,
    } else {
    }
    return
  }
  func.func @transform_0(%arg0: i32, %arg1: i32) -> (i32, i32) {
    %c0_i32 = arith.constant 0 : i32
    return %arg0, %arg1 : i32, i32
  }
  func.func @transform_1(%arg0: i32, %arg1: i32) -> (i32, i32) {
    %c0_i32 = arith.constant 0 : i32
    %c0_i32_0 = arith.constant 0 : i32
    %c0_i32_1 = arith.constant 0 : i32
    return %c0_i32, %c0_i32_0 : i32, i32
  }
  func.func @transform_2(%arg0: i32, %arg1: i32) -> i32 {
    %c0_i32 = arith.constant 0 : i32
    %c0_i32_0 = arith.constant 0 : i32
    return %c0_i32 : i32
  }
  func.func @transform_3(%arg0: i32, %arg1: i32) -> (i32, i32) {
    %c0_i32 = arith.constant 0 : i32
    %c0_i32_0 = arith.constant 0 : i32
    return %arg0, %c0_i32 : i32, i32
  }
}

</mosaic_0001>

<bundles_post_ra>
// kernel: tpu_custom_call.1
= control target key start
LH: loop header
LB: loop body
LE: loop exit
PB: predicated region body
PF: predicated region fallthrough
CT: control target
= control target key end

     0   :  { %s303_s0 = inlined_call_operand.hbm [shape: f32[2,1024], index: 0, kind: input, shape index: {}]   ;;  %s304_s1 = inlined_call_operand.hbm [shape: f32[1,1024], index: 1, kind: input, shape index: {}]   ;;  %s305_s2 = inlined_call_operand.<no memory space> [shape: f32[1], index: 2, kind: input, shape index: {}]   ;;  %s306_s3 = inlined_call_operand.vmem [shape: f32[2,1], index: 3, kind: output, shape index: {}]  }
   0x1   :  { %8 = sst [smem:[#allocation3]] %s305_s2 }
   0x2   :  { %9 = vsyncpa [#allocation5], 0 }
   0x3   :  { %10 = vsyncpa [#allocation7], 0 }
   0x4   :  { %15 = vsyncadd [#allocation5], 768  ;;  %s256_s14 = smov [#allocation4]  }
   0x5   :  { %s16_s15 = sshll.u32 %s256_s14, 4  ;;  %s17_s15 = int_to_ptr.vmem [resolvable:$true] %s16_s15 }
   0x6   :  { %s212_s16 = scalar_lea.vmem %s17_s15, 256  ;;  %s216_s17 = scalar_lea.vmem %s17_s15, 1024 }
   0x7   :  { %p213_p0 = scmp.ne.s32.totalorder %s17_s15, %s212_s16  ;;  %p217_p1 = scmp.lt.s32.totalorder %s17_s15, %s17_s15 }
   0x8   :  { %p218_p2 = scmp.lt.s32.totalorder %s216_s17, %s212_s16 }
   0xa   :  { %p219_p3 = por %p218_p2, %p217_p1 }
   0xc   :  { %p220_p4 = pnand %p219_p3, %p213_p0 }
   0xe   :  { %223 = shalt.err (!%p220_p4)
}
   0xf   :  { %s257_s18 = smov 256   ;;  %s258_s19 = smov 16  }
  0x10   :  { %22 = dma.hbm_to_vmem [thread:$0]  %s303_s0, 256, %s17_s15, [#allocation5], %s257_s18, %s257_s18, %s258_s19  }
  0x11   :  { %s259_s2 = smov [#allocation6]  }
  0x12   :  { %s29_s22 = sshll.u32 %s259_s2, 4  ;;  %s30_s22 = int_to_ptr.vmem [resolvable:$true] %s29_s22 }
  0x13   :  { %s232_s23 = scalar_lea.vmem %s30_s22, 128  ;;  %p237_p6 = scmp.lt.s32.totalorder %s30_s22, %s30_s22 }
  0x14   :  { %p233_p5 = scmp.ne.s32.totalorder %s30_s22, %s232_s23  ;;  %p238_p7 = scmp.lt.s32.totalorder %s232_s23, %s232_s23 }
  0x16   :  { %p239_p8 = por %p238_p7, %p237_p6 }
  0x18   :  { %p240_p9 = pnand %p239_p8, %p233_p5 }
  0x1a   :  { %243 = shalt.err (!%p240_p9)
}
  0x1b   :  { %32 = dma.hbm_to_vmem [thread:$0]  %s304_s1, 128, %s30_s22, [#allocation7]  }
  0x1c   :  { %248 = dma.done.wait [#allocation5], 1024  }
  0x1d   :  { %249 = vsyncadd [#allocation5], 4294966272 }
  0x1e   :  { %250 = dma.done.wait [#allocation7], 128  }
  0x1f   :  { %251 = vsyncadd [#allocation7], 4294967168  ;;  %v260_v0 = vmov 0.0   ;;  %s291_s0 = smov 0  }
  0x20   :  { %45 = vst [vmem:[#allocation2] sm:$0xff] %v260_v0 }
  0x21 LB: > { %v77_v1 = vlaneseq  ;;  %v261_v2 = vmov 1983009808   ;;  %s185_s26 = sshll.u32 %s254_s0, 7  ;;  %s51_s0 = sadd.s32 1, %s254_s0   ;;  %s254_s0 = sphi %s291_s0, %s51_s0  }
  0x22   : > { %v75_v3 = vunpack.c.l.s4 %v261_v2  ;;  %s55_s1 = sshra.s32 %s185_s26, 7  ;;  %p48_p10 = scmp.ge.s32.totalorder %s51_s0, 8  }
  0x23   : > { %v78_v4 = vshrl.u32 %v77_v1, 7  ;;  %s186_s27 = sshll.u32 %s55_s1, 1  ;;  %s65_s28 = scalar_lea.vmem [#allocation6], %s55_s1  ;;  %vm132_vm0 = vcmask (%p48_p10), 7168  }
  0x24   : > { %v76_v5 = vunpack.c.0.s8 %v75_v3  ;;  %v187_v6 = vld [vmem:[%s65_s28] ss:$0 sm:$0xff]  ;;  %s58_s29 = scalar_lea.vmem [#allocation4], %s186_s27  ;;  %s128_s30 = sld [smem:[#allocation3]] (%p48_p10) }
  0x25   : > { %v59_v8 = vld [vmem:[%s58_s29] sm:$0x3]  ;;  %v73_v9 = vcombine.high %v187_v6, %v187_v6  ;;  %v60_v12 = vld [vmem:[%s58_s29 + $0x10] sm:$0x3] }
  0x26   : > { %v79_v7 = vsub.s32 %v76_v5, %v78_v4  ;;  %v61_v10 = vld [vmem:[%s58_s29 + $0x20] sm:$0x3]  ;;  %v62_v14 = vld [vmem:[%s58_s29 + $0x30] sm:$0x3] }
  0x27   : > { %v67_v25 = vld [vmem:[#allocation2] sm:$0xff] }
  0x28   : > { %v80_v11 = vrot.slane %v187_v6, %v79_v7  ;;  %v87_v13 = vrot.slane %v73_v9, %v79_v7 }
  0x2a   : > { %v88_v15 = vcombine.high %v80_v11, %v80_v11  ;;  %v94_v16 = vmul.f32 %v80_v11, %v59_v8  ;;  %v89_v17 = vcombine.high %v87_v13, %v87_v13  ;;  %v96_v18 = vmul.f32 %v87_v13, %v61_v10 }
  0x2b   :  { %v129_v29 = vstv (%p48_p10), %s128_s30 }
  0x2c   : > { %v95_v19 = vmul.f32 %v88_v15, %v60_v12  ;;  %v97_v20 = vmul.f32 %v89_v17, %v62_v14 }
  0x2e   : > { %v102_v21 = vcombine.low %v94_v16, %v95_v19  ;;  %v103_v22 = vcombine.low %v96_v18, %v97_v20 }
  0x30   : > { %v110_v23 = vrot.slane %v102_v21, %v79_v7  ;;  %v117_v24 = vrot.slane %v103_v22, %v79_v7 }
  0x32   : > { %v118_v26 = vcombine.low %v110_v23, %v117_v24  ;;  %50 = sbr.rel (!%p48_p10) target bundleno = 33 (0x21), region = 91 }
  0x34   : > { %v120_v27 = vadd.f32 %v118_v26, %v67_v25 }
  0x36   : > { %121 = vst [vmem:[#allocation2] sm:$0xff] %v120_v27 }
  0x3d   :  { %v125_v28 = vld [vmem:[#allocation2] sm:$0xff] }
  0x3e   :  { %126 = vadd.xlane.f32.xlu0 %v125_v28 }
  0xc7   :  { %v127_v30 = vpop.xlane.xlu0 %126 }
  0xc8   :  { %v130_v31 = vadd.f32 %v129_v29, %v127_v30 }
  0xca   :  { %202 = vtanh.f32 %v130_v31 }
  0xd7   :  { %v203_v32 = vpop.eup %202 }
  0xd8   :  { %133 = vst.msk [vmem:[#allocation8] sm:$0xff] %vm132_vm0, %v203_v32 }
  0xdf   :  { %v152_v33 = vld [vmem:[#allocation8] sm:$0x3] }
  0xe0   :  { %153 = vst [vmem:[%s306_s3] sm:$0x3] %v152_v33 }
  0xe1   :  { %171 = vsyncpa [#allocation5], 1 }
  0xe2   :  { %172 = vsyncpa [#allocation7], 1 }

</bundles_post_ra>
